<compile_context>
chip_gen: v7x
topology: tpu7x:2x2x1
jax: 0.10.0
libtpu: 0.0.40
codegen_flags: <defaults>
</compile_context>

<pallas_src>
import functools

import jax
import jax.numpy as jnp
from jax.experimental import pallas as pl
from jax.experimental.pallas import tpu as pltpu


# ---------------------------------------------------------------------------
# Kernels (operate on the lane-dense flattened view (rows, T*D))
# ---------------------------------------------------------------------------
def _add_pe_kernel(x_ref, pe_ref, o_ref):
    # x_ref: (Bb, T*D) row block; pe_ref: (1, T*D) shared, broadcast over rows.
    o_ref[...] = x_ref[...] + pe_ref[...]


def _add_pe_dropout_kernel(x_ref, pe_ref, m_ref, o_ref, *, scale):
    # Inverted dropout: keep -> y * 1/(1-p), drop -> 0.  Mask is uint8 {0,1}.
    y = x_ref[...] + pe_ref[...]
    keep = m_ref[...] != 0
    o_ref[...] = jnp.where(keep, y * jnp.asarray(scale, y.dtype),
                           jnp.zeros_like(y))


# ---------------------------------------------------------------------------
# Tiling helper
# ---------------------------------------------------------------------------
def _pick_row_block(num_rows, row_bytes, target_bytes=2 << 20):
    """Rows per block: ~target_bytes per input tile, multiple of 8, <= num_rows."""
    bb = max(1, target_bytes // max(1, row_bytes))
    if bb >= num_rows:
        return int(num_rows)          # full dim -> always a legal block dim
    bb = max(8, (bb // 8) * 8)        # sublane-aligned
    return int(min(bb, num_rows))


# ---------------------------------------------------------------------------
# Wrapper
# ---------------------------------------------------------------------------
def learnable_positional_encoding(x, pe, *, p=0.1, training=False, seed=0):
    """x: (B, T, D), pe: (1, max_len, D).  Returns dropout(x + pe[:, :T])."""
    if not (0.0 <= p < 1.0):
        raise ValueError("dropout p must satisfy 0 <= p < 1")

    B, T, D = x.shape
    TD = T * D
    itemsize = jnp.dtype(x.dtype).itemsize

    # Lane-dense views: (B, T*D) and (1, T*D).  Static slice of pe (T is a
    # Python int), then cast to the activation dtype so the kernel streams a
    # single dtype end-to-end.
    x2 = x.reshape(B, TD)
    pe2 = pe[:, :T, :].reshape(1, TD).astype(x.dtype)

    bb = _pick_row_block(B, TD * itemsize)
    grid = (pl.cdiv(B, bb),)

    x_spec = pl.BlockSpec((bb, TD), lambda i: (i, 0))
    pe_spec = pl.BlockSpec((1, TD), lambda i: (0, 0))
    out_spec = pl.BlockSpec((bb, TD), lambda i: (i, 0))
    out_shape = jax.ShapeDtypeStruct((B, TD), x.dtype)

    cparams = pltpu.CompilerParams(dimension_semantics=("parallel",))

    if not training:
        cost = pl.CostEstimate(
            flops=B * TD,
            transcendentals=0,
            bytes_accessed=(2 * B * TD + TD) * itemsize,
        )
        out2 = pl.pallas_call(
            _add_pe_kernel,
            out_shape=out_shape,
            grid=grid,
            in_specs=[x_spec, pe_spec],
            out_specs=out_spec,
            compiler_params=cparams,
            cost_estimate=cost,
        )(x2, pe2)
        return out2.reshape(B, T, D)

    # Training path: host-generated keep mask (uint8), single where+mul in-kernel.
    key = jax.random.PRNGKey(seed)
    keep_mask = jax.random.bernoulli(key, 1.0 - p, (B, TD)).astype(jnp.uint8)
    m_spec = pl.BlockSpec((bb, TD), lambda i: (i, 0))
    scale = 1.0 / (1.0 - p)

    cost = pl.CostEstimate(
        flops=2 * B * TD,
        transcendentals=0,
        bytes_accessed=(2 * B * TD + TD) * itemsize + B * TD,
    )
    out2 = pl.pallas_call(
        functools.partial(_add_pe_dropout_kernel, scale=scale),
        out_shape=out_shape,
        grid=grid,
        in_specs=[x_spec, pe_spec, m_spec],
        out_specs=out_spec,
        compiler_params=cparams,
        cost_estimate=cost,
    )(x2, pe2, keep_mask)
    return out2.reshape(B, T, D)


# ---------------------------------------------------------------------------
# Main
# ---------------------------------------------------------------------------
if __name__ == "__main__":
    key = jax.random.PRNGKey(0)
    k_x, k_pe = jax.random.split(key)

    B, T, D = 2, 8, 32
    MAX_LEN = 500
    P = 0.1
    SEED = 123

    x = jax.random.normal(k_x, (B, T, D), dtype=jnp.float32)
    # Matches nn.Parameter(torch.rand(1, max_len, d_model)).uniform_(-0.1, 0.1)
    pe = jax.random.uniform(
        k_pe, (1, MAX_LEN, D), dtype=jnp.float32, minval=-0.1, maxval=0.1
    )

    # Eval-mode forward (dropout = identity): check against pure-JAX reference.
    out_eval = learnable_positional_encoding(x, pe, p=P, training=False)
    out_eval = jax.block_until_ready(out_eval)
    ref_eval = x + pe[:, :T]
    assert jnp.allclose(out_eval, ref_eval, atol=1e-6), "eval-mode mismatch"

    # Train-mode forward (inverted dropout): check against a reference built
    # from the identically derived keep mask.
    out_train = learnable_positional_encoding(
        x, pe, p=P, training=True, seed=SEED
    )
    out_train = jax.block_until_ready(out_train)
    keep_ref = jax.random.bernoulli(
        jax.random.PRNGKey(SEED), 1.0 - P, (B, T * D)
    ).reshape(B, T, D)
    ref_train = jnp.where(keep_ref, (x + pe[:, :T]) / (1.0 - P), 0.0)
    assert out_train.shape == (B, T, D)
    assert jnp.allclose(out_train, ref_train, atol=1e-5), "train-mode mismatch"

    print("KERNEL_OK")
</pallas_src>

<mosaic_0001>
module attributes {stable_mosaic.version = 11 : i64} {
  func.func @_add_pe_kernel(%arg0: i32, %arg1: memref<2x256xf32, #tpu.memory_space<vmem>>, %arg2: memref<1x256xf32, #tpu.memory_space<vmem>>, %arg3: memref<2x256xf32, #tpu.memory_space<vmem>>) attributes {dimension_semantics = [#tpu.dimension_semantics<parallel>], iteration_bounds = array<i64: 1>, scalar_prefetch = 0 : i64, scratch_operands = 0 : i64, tpu.core_type = #tpu.core_type<tc>, window_params = [{transform_indices = @transform_0, window_bounds = array<i64: 2, 256>}, {pipeline_mode = #tpu.pipeline_mode<synchronous>, transform_indices = @transform_1, window_bounds = array<i64: 1, 256>}, {transform_indices = @transform_2, window_bounds = array<i64: 2, 256>}]} {
    %c0 = arith.constant 0 : index
    %c0_0 = arith.constant 0 : index
    %0 = vector.load %arg1[%c0, %c0_0] : memref<2x256xf32, #tpu.memory_space<vmem>>, vector<2x256xf32>
    %c0_1 = arith.constant 0 : index
    %c0_2 = arith.constant 0 : index
    %1 = vector.load %arg2[%c0_1, %c0_2] : memref<1x256xf32, #tpu.memory_space<vmem>>, vector<1x256xf32>
    %2 = vector.broadcast %1 : vector<1x256xf32> to vector<2x256xf32>
    %3 = arith.addf %0, %2 : vector<2x256xf32>
    %c0_3 = arith.constant 0 : index
    %c0_4 = arith.constant 0 : index
    %4 = vector.load %arg3[%c0_3, %c0_4] : memref<2x256xf32, #tpu.memory_space<vmem>>, vector<2x256xf32>
    tpu.vector_store %arg3[%c0_3, %c0_4], %3 {strides = array<i32>} : memref<2x256xf32, #tpu.memory_space<vmem>>, vector<2x256xf32>,
    return
  }
  func.func @transform_0(%arg0: i32) -> (i32, i32) {
    %c0_i32 = arith.constant 0 : i32
    %c0_i32_0 = arith.constant 0 : i32
    return %arg0, %c0_i32 : i32, i32
  }
  func.func @transform_1(%arg0: i32) -> (i32, i32) {
    %c0_i32 = arith.constant 0 : i32
    %c0_i32_0 = arith.constant 0 : i32
    %c0_i32_1 = arith.constant 0 : i32
    return %c0_i32, %c0_i32_0 : i32, i32
  }
  func.func @transform_2(%arg0: i32) -> (i32, i32) {
    %c0_i32 = arith.constant 0 : i32
    %c0_i32_0 = arith.constant 0 : i32
    return %arg0, %c0_i32 : i32, i32
  }
}

</mosaic_0001>

<bundles_post_ra>
// kernel: tpu_custom_call.1
= control target key start
LH: loop header
LB: loop body
LE: loop exit
PB: predicated region body
PF: predicated region fallthrough
CT: control target
= control target key end

     0   :  { %7 = vsyncpa [#allocation3], 0  ;;  %s157_s0 = inlined_call_operand.hbm [shape: f32[2,256], index: 0, kind: input, shape index: {}]   ;;  %s158_s1 = inlined_call_operand.vmem [shape: f32[1,256], index: 1, kind: input, shape index: {}]   ;;  %s159_s2 = inlined_call_operand.hbm [shape: f32[2,256], index: 2, kind: output, shape index: {}]  }
   0x1   :  { %8 = vsyncpa [#allocation4], 0  ;;  %s112_s9 = smov [#allocation2]   ;;  %s64_s13 = scalar_lea.hbm %s157_s0, 64 }
   0x2   :  { %s15_s10 = sshll.u32 %s112_s9, 4  ;;  %p65_p0 = scmp.ne.s32.totalorder %s157_s0, %s64_s13  ;;  %s16_s10 = int_to_ptr.vmem [resolvable:$true] %s15_s10 }
   0x3   :  { %p68_p1 = scmp.lt.u32.totalorder %s64_s13, %s157_s0 }
   0x5   :  { %p70_p2 = pnand %p68_p1, %p65_p0 }
   0x7   :  { %73 = shalt.err (!%p70_p2)
}
   0x8   :  { %s74_s18 = scalar_lea.vmem %s16_s10, 64  ;;  %p79_p4 = scmp.lt.s32.totalorder %s16_s10, %s16_s10 }
   0x9   :  { %p75_p3 = scmp.ne.s32.totalorder %s16_s10, %s74_s18  ;;  %p80_p5 = scmp.lt.s32.totalorder %s74_s18, %s74_s18 }
   0xb   :  { %p81_p6 = por %p80_p5, %p79_p4 }
   0xd   :  { %p82_p7 = pnand %p81_p6, %p75_p3 }
   0xf   :  { %85 = shalt.err (!%p82_p7)
}
  0x10   :  { %18 = dma.hbm_to_vmem [thread:$0]  %s157_s0, 64, %s16_s10, [#allocation3]  }
  0x11   :  { %108 = dma.done.wait [#allocation3], 64  }
  0x12   :  { %109 = vsyncadd [#allocation3], 4294967232  ;;  %v27_v0 = vlaneseq  ;;  %v113_v1 = vmov 1983009808   ;;  %v25_v7 = vld [vmem:[%s158_s1] sm:$0x3] }
  0x13   :  { %v37_v2 = vunpack.c.l.s4 %v113_v1  ;;  %v24_v12 = vld [vmem:[#allocation2] sm:$0xf]  ;;  %s114_s23 = smov [#allocation5]  }
  0x14   :  { %v28_v3 = vshrl.u32 %v27_v0, 7  ;;  %s52_s0 = sshll.u32 %s114_s23, 4  ;;  %s53_s0 = int_to_ptr.vmem [resolvable:$true] %s52_s0 }
  0x15   :  { %v38_v6 = vunpack.c.0.s8 %v37_v2  ;;  %s86_s24 = scalar_lea.vmem %s53_s0, 64  ;;  %p91_p9 = scmp.lt.s32.totalorder %s53_s0, %s53_s0 }
  0x16   :  { %v29_v4 = vsub.s32 0, %v28_v3  ;;  %v33_v5 = vsub.s32 1, %v28_v3  ;;  %p87_p8 = scmp.ne.s32.totalorder %s53_s0, %s86_s24  ;;  %p92_p10 = scmp.lt.s32.totalorder %s86_s24, %s86_s24 }
  0x17   :  { %v41_v10 = vsub.s32 %v38_v6, %v28_v3 }
  0x18   :  { %v30_v8 = vrot.slane %v25_v7, %v29_v4  ;;  %v34_v9 = vrot.slane %v25_v7, %v33_v5  ;;  %p93_p11 = por %p92_p10, %p91_p9 }
  0x1a   :  { %v35_v11 = vcombine.low %v30_v8, %v34_v9  ;;  %p94_p12 = pnand %p93_p11, %p87_p8 }
  0x1c   :  { %v42_v13 = vrot.slane %v35_v11, %v41_v10 }
  0x1e   :  { %v44_v14 = vadd.f32 %v42_v13, %v24_v12 }
  0x20   :  { %45 = vst [vmem:[#allocation5] sm:$0xf] %v44_v14 }
  0x21   :  { %97 = shalt.err (!%p94_p12)
}
  0x22   :  { %s98_s26 = scalar_lea.hbm %s159_s2, 64 }
  0x23   :  { %p99_p13 = scmp.ne.s32.totalorder %s159_s2, %s98_s26  ;;  %p102_p0 = scmp.lt.u32.totalorder %s98_s26, %s159_s2 }
  0x25   :  { %p104_p1 = pnand %p102_p0, %p99_p13 }
  0x27   :  { %107 = shalt.err (!%p104_p1)
}
  0x28   :  { %55 = dma.vmem_to_hbm [thread:$0]  %s53_s0, 64, %s159_s2, [#allocation4]  }
  0x29   :  { %110 = dma.done.wait [#allocation4], 64  }
  0x2a   :  { %111 = vsyncadd [#allocation4], 4294967232 }
  0x2b   :  { %59 = vsyncpa [#allocation3], 1 }
  0x2c   :  { %60 = vsyncpa [#allocation4], 1 }

</bundles_post_ra>
